<compile_context>
chip_gen: v5e
topology: v5e:2x2
jax: 0.10.0
libtpu: 0.0.40
codegen_flags: <defaults>
</compile_context>

<pallas_src>
import jax
import jax.numpy as jnp
from jax import lax
from jax.experimental import pallas as pl
from jax.experimental.pallas import tpu as pltpu


def lora_kernel(alpha_ref, x_ref, wat_ref, wb_ref, o_ref, xa_acc):
    k = pl.program_id(2)

    @pl.when(k == 0)
    def _():
        xa_acc[...] = jnp.zeros_like(xa_acc)

    # x tile (tm, tk) contracted with W_a^T tile (rank, tk) over the lane (tk) axis
    # -> (tm, rank), accumulated in f32 on the MXU.
    xa_acc[...] += lax.dot_general(
        x_ref[...],
        wat_ref[...],
        dimension_numbers=(((1,), (1,)), ((), ())),
        preferred_element_type=jnp.float32,
    )

    @pl.when(k == pl.num_programs(2) - 1)
    def _():
        alpha = alpha_ref[0]
        # Scale the tiny low-rank intermediate (cheap), cast to W_b's dtype for the MXU.
        xa = (alpha * xa_acc[...]).astype(wb_ref.dtype)
        o_ref[...] = jnp.dot(
            xa, wb_ref[...], preferred_element_type=jnp.float32
        ).astype(o_ref.dtype)


def _pick_tile(dim, candidates):
    for t in candidates:
        if dim % t == 0:
            return t
    return dim  # small / indivisible dim -> use the full extent (always legal)


def lora_forward(x, w_a, w_b, alpha, *, tm=None, tn=None, tk=None):
    batch, in_dim = x.shape
    rank, out_dim = w_b.shape
    assert w_a.shape == (in_dim, rank)

    # Tile sizes: as large (lane-dense, MXU-aligned) as the dims allow.
    tm = tm or _pick_tile(batch, (256, 128, 64, 32, 16, 8))
    tn = tn or _pick_tile(out_dim, (512, 256, 128))
    tk = tk or _pick_tile(in_dim, (512, 256, 128))
    assert batch % tm == 0 and out_dim % tn == 0 and in_dim % tk == 0

    # Lane-dense W_a layout: put in_dim on the 128-lane axis instead of rank.
    w_a_t = jnp.transpose(w_a)  # (rank, in_dim)
    alpha_arr = jnp.asarray(alpha, jnp.float32).reshape((1,))

    grid = (batch // tm, out_dim // tn, in_dim // tk)  # reduction axis last

    grid_spec = pltpu.PrefetchScalarGridSpec(
        num_scalar_prefetch=1,  # alpha -> SMEM, no recompile when it changes
        grid=grid,
        in_specs=[
            pl.BlockSpec((tm, tk), lambda i, j, k, a: (i, k)),     # x tile
            pl.BlockSpec((rank, tk), lambda i, j, k, a: (0, k)),   # W_a^T tile
            pl.BlockSpec((rank, tn), lambda i, j, k, a: (0, j)),   # W_b tile
        ],
        out_specs=pl.BlockSpec((tm, tn), lambda i, j, k, a: (i, j)),
        scratch_shapes=[pltpu.VMEM((tm, rank), jnp.float32)],      # x @ W_a accumulator
    )

    return pl.pallas_call(
        lora_kernel,
        out_shape=jax.ShapeDtypeStruct((batch, out_dim), x.dtype),
        grid_spec=grid_spec,
        compiler_params=pltpu.CompilerParams(
            dimension_semantics=("parallel", "parallel", "arbitrary"),
        ),
    )(alpha_arr, x, w_a_t, w_b)


if __name__ == "__main__":
    # Small-but-real shapes: lane-dense feature dims (multiples of 128), tiny rank.
    in_dim, out_dim, rank, alpha = 256, 256, 4, 8.0
    batch = 64

    key = jax.random.PRNGKey(0)
    k_x, k_wa, k_wb = jax.random.split(key, 3)

    # Module-faithful init: W_a ~ randn(in_dim, rank) / sqrt(rank), W_b = zeros.
    std_dev = 1.0 / jnp.sqrt(jnp.float32(rank))
    W_a = jax.random.normal(k_wa, (in_dim, rank), dtype=jnp.float32) * std_dev
    W_b_zero = jnp.zeros((rank, out_dim), dtype=jnp.float32)
    # Non-vacuous correctness check needs a nonzero W_b (zero-init makes any test pass).
    W_b_rand = jax.random.normal(k_wb, (rank, out_dim), dtype=jnp.float32)

    x = jax.random.normal(k_x, (batch, in_dim), dtype=jnp.float32)

    ref = alpha * jnp.dot(
        jnp.dot(x, W_a, precision=lax.Precision.HIGHEST),
        W_b_rand,
        precision=lax.Precision.HIGHEST,
    )

    # (1) Module-faithful init (W_b = 0): output must be (exactly) zero.
    out0 = jax.block_until_ready(lora_forward(x, W_a, W_b_zero, alpha))
    assert out0.shape == (batch, out_dim)
    assert float(jnp.max(jnp.abs(out0))) < 1e-6

    # (2) Nonzero W_b with an explicit (2, 2, 2) grid so the K-reduction accumulator,
    #     multi-tile output, and megacore-parallel axes are all exercised.
    out1 = jax.block_until_ready(
        lora_forward(x, W_a, W_b_rand, alpha, tm=32, tn=128, tk=128)
    )
    rel1 = float(jnp.linalg.norm(out1 - ref) / jnp.linalg.norm(ref))
    assert rel1 < 1e-2, f"relative error too large (tiled grid): {rel1}"

    # (3) Default (largest-tile) configuration with nonzero W_b.
    out2 = jax.block_until_ready(lora_forward(x, W_a, W_b_rand, alpha))
    rel2 = float(jnp.linalg.norm(out2 - ref) / jnp.linalg.norm(ref))
    assert rel2 < 1e-2, f"relative error too large (default tiles): {rel2}"

    print("KERNEL_OK")
</pallas_src>

<mosaic_0001>
module attributes {stable_mosaic.version = 11 : i64} {
  func.func @lora_kernel(%arg0: i32, %arg1: i32, %arg2: i32, %arg3: memref<1xf32, #tpu.memory_space<smem>>, %arg4: memref<64x256xf32, #tpu.memory_space<vmem>>, %arg5: memref<4x256xf32, #tpu.memory_space<vmem>>, %arg6: memref<4x256xf32, #tpu.memory_space<vmem>>, %arg7: memref<64x256xf32, #tpu.memory_space<vmem>>, %arg8: memref<64x4xf32, #tpu.memory_space<vmem>>) attributes {dimension_semantics = [#tpu.dimension_semantics<parallel>, #tpu.dimension_semantics<parallel>, #tpu.dimension_semantics<arbitrary>], iteration_bounds = array<i64: 1, 1, 1>, scalar_prefetch = 1 : i64, scratch_operands = 1 : i64, tpu.core_type = #tpu.core_type<tc>, window_params = [{transform_indices = @transform_0, window_bounds = array<i64: 64, 256>}, {transform_indices = @transform_1, window_bounds = array<i64: 4, 256>}, {transform_indices = @transform_2, window_bounds = array<i64: 4, 256>}, {transform_indices = @transform_3, window_bounds = array<i64: 64, 256>}]} {
    %c0_i32 = arith.constant 0 : i32
    %0 = arith.cmpi eq, %arg2, %c0_i32 : i32
    %1 = arith.extui %0 : i1 to i32
    %c0_i32_0 = arith.constant 0 : i32
    %2 = arith.cmpi ne, %1, %c0_i32_0 : i32
    scf.if %2 {
      %cst_10 = arith.constant 0.000000e+00 : f32
      %12 = vector.broadcast %cst_10 : f32 to vector<64x4xf32>
      %c0_11 = arith.constant 0 : index
      %c0_12 = arith.constant 0 : index
      %13 = vector.load %arg8[%c0_11, %c0_12] : memref<64x4xf32, #tpu.memory_space<vmem>>, vector<64x4xf32>
      tpu.vector_store %arg8[%c0_11, %c0_12], %12 {strides = array<i32>} : memref<64x4xf32, #tpu.memory_space<vmem>>, vector<64x4xf32>,
    } else {
    }
    %c0 = arith.constant 0 : index
    %c0_1 = arith.constant 0 : index
    %3 = vector.load %arg8[%c0, %c0_1] : memref<64x4xf32, #tpu.memory_space<vmem>>, vector<64x4xf32>
    %c0_2 = arith.constant 0 : index
    %c0_3 = arith.constant 0 : index
    %4 = vector.load %arg4[%c0_2, %c0_3] : memref<64x256xf32, #tpu.memory_space<vmem>>, vector<64x256xf32>
    %c0_4 = arith.constant 0 : index
    %c0_5 = arith.constant 0 : index
    %5 = vector.load %arg5[%c0_4, %c0_5] : memref<4x256xf32, #tpu.memory_space<vmem>>, vector<4x256xf32>
    %cst = arith.constant dense<0.000000e+00> : vector<64x4xf32>
    %6 = tpu.matmul %4, %5, %cst {dimension_numbers = #tpu.dot_dimension_numbers<[1], [1], [0], [0], [0, 0, 1, 0], [], []>} : vector<64x256xf32>, vector<4x256xf32>, vector<64x4xf32> -> vector<64x4xf32>
    %7 = arith.addf %3, %6 : vector<64x4xf32>
    %c0_6 = arith.constant 0 : index
    %c0_7 = arith.constant 0 : index
    %8 = vector.load %arg8[%c0_6, %c0_7] : memref<64x4xf32, #tpu.memory_space<vmem>>, vector<64x4xf32>
    tpu.vector_store %arg8[%c0_6, %c0_7], %7 {strides = array<i32>} : memref<64x4xf32, #tpu.memory_space<vmem>>, vector<64x4xf32>,
    %c0_i32_8 = arith.constant 0 : i32
    %9 = arith.cmpi eq, %arg2, %c0_i32_8 : i32
    %10 = arith.extui %9 : i1 to i32
    %c0_i32_9 = arith.constant 0 : i32
    %11 = arith.cmpi ne, %10, %c0_i32_9 : i32
    scf.if %11 {
      %c0_10 = arith.constant 0 : index
      %12 = memref.load %arg3[%c0_10] : memref<1xf32, #tpu.memory_space<smem>>
      %c0_11 = arith.constant 0 : index
      %c0_12 = arith.constant 0 : index
      %13 = vector.load %arg8[%c0_11, %c0_12] : memref<64x4xf32, #tpu.memory_space<vmem>>, vector<64x4xf32>
      %14 = vector.broadcast %12 : f32 to vector<64x4xf32>
      %15 = arith.mulf %14, %13 : vector<64x4xf32>
      %c0_13 = arith.constant 0 : index
      %c0_14 = arith.constant 0 : index
      %16 = vector.load %arg6[%c0_13, %c0_14] : memref<4x256xf32, #tpu.memory_space<vmem>>, vector<4x256xf32>
      %cst_15 = arith.constant dense<0.000000e+00> : vector<64x256xf32>
      %17 = tpu.matmul %15, %16, %cst_15 {dimension_numbers = #tpu.dot_dimension_numbers<[1], [0], [0], [1], [0, 0, 1, 1], [], []>} : vector<64x4xf32>, vector<4x256xf32>, vector<64x256xf32> -> vector<64x256xf32>
      %c0_16 = arith.constant 0 : index
      %c0_17 = arith.constant 0 : index
      %18 = vector.load %arg7[%c0_16, %c0_17] : memref<64x256xf32, #tpu.memory_space<vmem>>, vector<64x256xf32>
      tpu.vector_store %arg7[%c0_16, %c0_17], %17 {strides = array<i32>} : memref<64x256xf32, #tpu.memory_space<vmem>>, vector<64x256xf32>,
    } else {
    }
    return
  }
  func.func @transform_0(%arg0: i32, %arg1: i32, %arg2: i32, %arg3: memref<1xf32, #tpu.memory_space<smem>>) -> (i32, i32) {
    %c0_i32 = arith.constant 0 : i32
    return %arg0, %arg2 : i32, i32
  }
  func.func @transform_1(%arg0: i32, %arg1: i32, %arg2: i32, %arg3: memref<1xf32, #tpu.memory_space<smem>>) -> (i32, i32) {
    %c0_i32 = arith.constant 0 : i32
    %c0_i32_0 = arith.constant 0 : i32
    return %c0_i32, %arg2 : i32, i32
  }
  func.func @transform_2(%arg0: i32, %arg1: i32, %arg2: i32, %arg3: memref<1xf32, #tpu.memory_space<smem>>) -> (i32, i32) {
    %c0_i32 = arith.constant 0 : i32
    %c0_i32_0 = arith.constant 0 : i32
    return %c0_i32, %arg1 : i32, i32
  }
  func.func @transform_3(%arg0: i32, %arg1: i32, %arg2: i32, %arg3: memref<1xf32, #tpu.memory_space<smem>>) -> (i32, i32) {
    %c0_i32 = arith.constant 0 : i32
    return %arg0, %arg1 : i32, i32
  }
}

</mosaic_0001>

<bundles_post_ra>
// kernel: tpu_custom_call.1
= control target key start
LH: loop header
LB: loop body
LE: loop exit
PB: predicated region body
PF: predicated region fallthrough
CT: control target
= control target key end

     0   :  { %10 = vsyncpa [#allocation6], 0  ;;  %s598_s0 = inlined_call_operand.<no memory space> [shape: f32[1], index: 0, kind: input, shape index: {}]   ;;  %s599_s1 = inlined_call_operand.hbm [shape: f32[64,256], index: 1, kind: input, shape index: {}]   ;;  %s600_s2 = inlined_call_operand.hbm [shape: f32[4,256], index: 2, kind: input, shape index: {}]   ;;  %s601_s3 = inlined_call_operand.hbm [shape: f32[4,256], index: 3, kind: input, shape index: {}]   ;;  %s602_s4 = inlined_call_operand.hbm [shape: f32[64,256], index: 4, kind: output, shape index: {}]  }
   0x1   :  { %11 = vsyncpa [#allocation9], 0  ;;  %s31_s17 = sshll.u32 %s600_s2, 4  ;;  %s32_s17 = int_to_ptr.hbm [resolvable:$true] %s31_s17 }
   0x2   :  { %12 = vsyncpa [#allocation7], 0  ;;  %s503_s18 = smov [#allocation8]   ;;  %s17_s22 = sshll.u32 %s599_s1, 4  ;;  %s18_s22 = int_to_ptr.hbm [resolvable:$true] %s17_s22 }
   0x3   :  { %s33_s19 = sshll.u32 %s503_s18, 4  ;;  %s504_s23 = smov [#allocation5]   ;;  %s34_s19 = int_to_ptr.vmem [resolvable:$true] %s33_s19 }
   0x4   :  { %36 = dma.hbm_to_vmem [thread:$0]  %s32_s17, 128, %s34_s19, [#allocation9]  }
   0x5   :  { %s19_s24 = sshll.u32 %s504_s23, 4  ;;  %s505_s25 = smov 256   ;;  %s20_s24 = int_to_ptr.vmem [resolvable:$true] %s19_s24 }
   0x6   :  { %s506_s26 = smov 16   ;;  %s42_s28 = sshll.u32 %s601_s3, 4  ;;  %s43_s28 = int_to_ptr.hbm [resolvable:$true] %s42_s28 }
   0x7   :  { %25 = dma.hbm_to_vmem [thread:$0]  %s18_s22, 2048, %s20_s24, [#allocation6], %s505_s25, %s505_s25, %s506_s26  }
   0x8   :  { %s507_s29 = smov [#allocation10]  }
   0x9   :  { %s44_s30 = sshll.u32 %s507_s29, 4  ;;  %s45_s30 = int_to_ptr.vmem [resolvable:$true] %s44_s30 }
   0xa   :  { %47 = dma.hbm_to_vmem [thread:$0]  %s43_s28, 128, %s45_s30, [#allocation9]  }
   0xb   :  { %497 = dma.done.wait [#allocation6], 2048  }
   0xc   :  { %498 = vsyncadd [#allocation6], 4294965248 }
   0xd   :  { %499 = dma.done.wait [#allocation9], 256  }
   0xe   :  { %500 = vsyncadd [#allocation9], 4294967040  ;;  %v97_v0 = vld [vmem:[#allocation8] sm:$0xff]  ;;  %v224_v1 = vld [vmem:[#allocation10] sm:$0xff]  ;;  %vm64_vm0 = vcmask 31744   ;;  %v508_v20 = vmov 0.0   ;;  %v559_v32 = vstv %s598_s0 }
   0xf   :  { %99 = vst [vmem:[#allocation1] ss:$2 sm:$0xff] %v97_v0  ;;  %v81_v4 = vld [vmem:[#allocation5] sm:$0xff]  ;;  %v82_v5 = vld [vmem:[#allocation5 + $0x8] sm:$0xff]  ;;  %v83_v6 = vld [vmem:[#allocation5 + $0x10] sm:$0xff]  ;;  %vm253_vm1 = vcmask 1043456  }
  0x10   :  { %v84_v7 = vld [vmem:[#allocation5 + $0x18] sm:$0xff]  ;;  %v85_v8 = vld [vmem:[#allocation5 + $0x20] sm:$0xff]  ;;  %v86_v9 = vld [vmem:[#allocation5 + $0x28] sm:$0xff]  ;;  %65 = vst.msk [vmem:[#allocation2] sm:$0xff] %vm64_vm0, %v508_v20  ;;  %s509_s0 = smov [#allocation11]   ;;  %s362_s8 = sshll.u32 %s602_s4, 4  ;;  %s363_s8 = int_to_ptr.hbm [resolvable:$true] %s362_s8 }
  0x11   :  { %v87_v10 = vld [vmem:[#allocation5 + $0x30] sm:$0xff]  ;;  %v88_v11 = vld [vmem:[#allocation5 + $0x38] sm:$0xff]  ;;  %v89_v12 = vld [vmem:[#allocation5 + $0x40] sm:$0xff]  ;;  %66 = vst.msk [vmem:[#allocation2 + $0x8] sm:$0xff] %vm64_vm0, %v508_v20  ;;  %s360_s5 = sshll.u32 %s509_s0, 4  ;;  %s361_s5 = int_to_ptr.vmem [resolvable:$true] %s360_s5 }
  0x12   :  { %v90_v13 = vld [vmem:[#allocation5 + $0x48] sm:$0xff]  ;;  %v91_v14 = vld [vmem:[#allocation5 + $0x50] sm:$0xff]  ;;  %v92_v15 = vld [vmem:[#allocation5 + $0x58] sm:$0xff]  ;;  %67 = vst.msk [vmem:[#allocation2 + $0x10] sm:$0xff] %vm64_vm0, %v508_v20 }
  0x13   :  { %v93_v16 = vld [vmem:[#allocation5 + $0x60] sm:$0xff]  ;;  %v94_v17 = vld [vmem:[#allocation5 + $0x68] sm:$0xff]  ;;  %v95_v18 = vld [vmem:[#allocation5 + $0x70] sm:$0xff]  ;;  %68 = vst.msk [vmem:[#allocation2 + $0x18] sm:$0xff] %vm64_vm0, %v508_v20 }
  0x14   :  { %v96_v19 = vld [vmem:[#allocation5 + $0x78] sm:$0xff]  ;;  %69 = vst.msk [vmem:[#allocation2 + $0x20] sm:$0xff] %vm64_vm0, %v508_v20 }
  0x15   :  { %70 = vst.msk [vmem:[#allocation2 + $0x28] sm:$0xff] %vm64_vm0, %v508_v20 }
  0x16   :  { %v100_v2 = vld.sshfl [vmem:[#allocation1] sm:$0xff pattern:$0x75316420]  ;;  %v101_v3 = vld.sshfl [vmem:[#allocation1 + $0x8] sm:$0xff pattern:$0x75316420] }
  0x17   :  { %119 = vmatpush.xpose.msra.mxu0 %v100_v2  ;;  %160 = vmatpush.xpose.msra.mxu1 %v101_v3  ;;  %226 = vst [vmem:[#allocation1] ss:$2 sm:$0xff] %v224_v1  ;;  %v73_v24 = vld [vmem:[#allocation2] sm:$0xff] }
  0x18   :  { %71 = vst.msk [vmem:[#allocation2 + $0x30] sm:$0xff] %vm64_vm0, %v508_v20  ;;  %v74_v29 = vld [vmem:[#allocation2 + $0x8] sm:$0xff] }
  0x19   :  { %72 = vst.msk [vmem:[#allocation2 + $0x38] sm:$0xff] %vm64_vm0, %v508_v20  ;;  %v75_v37 = vld [vmem:[#allocation2 + $0x10] sm:$0xff] }
  0x1a   :  { %120 = vmatmul.f32.vlgmr.msra.gmra.mxu0 %v81_v4  ;;  %161 = vmatmul.f32.vlgmr.msra.gmra.mxu1 %v82_v5  ;;  %v76_v44 = vld [vmem:[#allocation2 + $0x18] sm:$0xff] }
  0x1b   :  { %v77_v51 = vld [vmem:[#allocation2 + $0x20] sm:$0xff] }
  0x1c   :  { %v78_v58 = vld [vmem:[#allocation2 + $0x28] sm:$0xff] }
  0x1e   :  { %v227_v21 = vld.sshfl [vmem:[#allocation1] sm:$0xff pattern:$0x75316420]  ;;  %v228_v22 = vld.sshfl [vmem:[#allocation1 + $0x8] sm:$0xff pattern:$0x75316420] }
  0x1f   :  { %376 = vmatpush.msk.msra.mxu2 %vm253_vm1, %v227_v21  ;;  %385 = vmatpush.msk.msra.mxu3 %vm253_vm1, %v228_v22  ;;  %v79_v1 = vld [vmem:[#allocation2 + $0x30] sm:$0xff] }
  0x22   :  { %123 = vmatmul.f32.gmra.mxu0 %v83_v6  ;;  %164 = vmatmul.f32.gmra.mxu1 %v84_v7 }
  0x2a   :  { %126 = vmatmul.f32.gmra.mxu0 %v85_v8  ;;  %167 = vmatmul.f32.gmra.mxu1 %v86_v9  ;;  %v80_v8 = vld [vmem:[#allocation2 + $0x38] sm:$0xff] }
  0x32   :  { %129 = vmatmul.f32.gmra.mxu0 %v87_v10  ;;  %170 = vmatmul.f32.gmra.mxu1 %v88_v11 }
  0x3a   :  { %132 = vmatmul.f32.gmra.mxu0 %v89_v12  ;;  %173 = vmatmul.f32.gmra.mxu1 %v90_v13 }
  0x42   :  { %135 = vmatmul.f32.gmra.mxu0 %v91_v14  ;;  %176 = vmatmul.f32.gmra.mxu1 %v92_v15 }
  0x4a   :  { %138 = vmatmul.f32.gmra.mxu0 %v93_v16  ;;  %179 = vmatmul.f32.gmra.mxu1 %v94_v17 }
  0x52   :  { %141 = vmatmul.f32.gmra.mxu0 %v95_v18  ;;  %182 = vmatmul.f32.gmra.mxu1 %v96_v19 }
  0x97   :  { %v121_v23 = vpop.f32.mrf.mxu0  ;;  %v162_v25 = vpop.f32.mrf.mxu1 }
  0x98   :  { %v163_v26 = vadd.f32 %v162_v25, %v121_v23 }
  0x9a   :  { %v186_v27 = vadd.f32 %v163_v26, %v73_v24 }
  0x9c   :  { %195 = vst.msk [vmem:[#allocation2] sm:$0xff] %vm64_vm0, %v186_v27 }
  0x9f   :  { %v124_v28 = vpop.f32.mrf.mxu0  ;;  %v165_v30 = vpop.f32.mrf.mxu1 }
  0xa0   :  { %v166_v31 = vadd.f32 %v165_v30, %v124_v28 }
  0xa2   :  { %v187_v33 = vadd.f32 %v166_v31, %v74_v29 }
  0xa3   :  { %v207_v34 = vld [vmem:[#allocation2] sm:$0xff] }
  0xa4   :  { %196 = vst.msk [vmem:[#allocation2 + $0x8] sm:$0xff] %vm64_vm0, %v187_v33  ;;  %v216_v35 = vmul.f32 %v559_v32, %v207_v34 }
  0xa6   :  { %377 = vmatmul.msk.f32.vlgmr.msra.gmra.mxu2 %vm64_vm0, %v216_v35  ;;  %386 = vmatmul.msk.f32.vlgmr.msra.gmra.mxu3 %vm64_vm0, %v216_v35 }
  0xa7   :  { %v127_v36 = vpop.f32.mrf.mxu0  ;;  %v168_v38 = vpop.f32.mrf.mxu1 }
  0xa8   :  { %v169_v39 = vadd.f32 %v168_v38, %v127_v36 }
  0xaa   :  { %v188_v40 = vadd.f32 %v169_v39, %v75_v37 }
  0xab   :  { %v208_v41 = vld [vmem:[#allocation2 + $0x8] sm:$0xff] }
  0xac   :  { %197 = vst.msk [vmem:[#allocation2 + $0x10] sm:$0xff] %vm64_vm0, %v188_v40  ;;  %v217_v42 = vmul.f32 %v559_v32, %v208_v41 }
  0xae   :  { %378 = vmatmul.msk.f32.gmra.mxu2 %vm64_vm0, %v217_v42  ;;  %387 = vmatmul.msk.f32.gmra.mxu3 %vm64_vm0, %v217_v42 }
  0xaf   :  { %v130_v43 = vpop.f32.mrf.mxu0  ;;  %v171_v45 = vpop.f32.mrf.mxu1 }
  0xb0   :  { %v172_v46 = vadd.f32 %v171_v45, %v130_v43 }
  0xb2   :  { %v189_v47 = vadd.f32 %v172_v46, %v76_v44 }
  0xb3   :  { %v209_v48 = vld [vmem:[#allocation2 + $0x10] sm:$0xff] }
  0xb4   :  { %198 = vst.msk [vmem:[#allocation2 + $0x18] sm:$0xff] %vm64_vm0, %v189_v47  ;;  %v218_v49 = vmul.f32 %v559_v32, %v209_v48 }
  0xb6   :  { %379 = vmatmul.msk.f32.gmra.mxu2 %vm64_vm0, %v218_v49  ;;  %388 = vmatmul.msk.f32.gmra.mxu3 %vm64_vm0, %v218_v49 }
  0xb7   :  { %v133_v50 = vpop.f32.mrf.mxu0  ;;  %v174_v52 = vpop.f32.mrf.mxu1 }
  0xb8   :  { %v175_v53 = vadd.f32 %v174_v52, %v133_v50 }
  0xba   :  { %v190_v54 = vadd.f32 %v175_v53, %v77_v51 }
  0xbb   :  { %v210_v55 = vld [vmem:[#allocation2 + $0x18] sm:$0xff] }
  0xbc   :  { %199 = vst.msk [vmem:[#allocation2 + $0x20] sm:$0xff] %vm64_vm0, %v190_v54  ;;  %v219_v56 = vmul.f32 %v559_v32, %v210_v55 }
  0xbe   :  { %380 = vmatmul.msk.f32.gmra.mxu2 %vm64_vm0, %v219_v56  ;;  %389 = vmatmul.msk.f32.gmra.mxu3 %vm64_vm0, %v219_v56 }
  0xbf   :  { %v136_v57 = vpop.f32.mrf.mxu0  ;;  %v177_v59 = vpop.f32.mrf.mxu1 }
  0xc0   :  { %v178_v60 = vadd.f32 %v177_v59, %v136_v57 }
  0xc2   :  { %v191_v61 = vadd.f32 %v178_v60, %v78_v58 }
  0xc3   :  { %v211_v62 = vld [vmem:[#allocation2 + $0x20] sm:$0xff] }
  0xc4   :  { %200 = vst.msk [vmem:[#allocation2 + $0x28] sm:$0xff] %vm64_vm0, %v191_v61  ;;  %v220_v63 = vmul.f32 %v559_v32, %v211_v62 }
  0xc6   :  { %381 = vmatmul.msk.f32.gmra.mxu2 %vm64_vm0, %v220_v63  ;;  %390 = vmatmul.msk.f32.gmra.mxu3 %vm64_vm0, %v220_v63 }
  0xc7   :  { %v139_v0 = vpop.f32.mrf.mxu0  ;;  %v180_v2 = vpop.f32.mrf.mxu1 }
  0xc8   :  { %v181_v3 = vadd.f32 %v180_v2, %v139_v0 }
  0xca   :  { %v192_v4 = vadd.f32 %v181_v3, %v79_v1 }
  0xcb   :  { %v212_v5 = vld [vmem:[#allocation2 + $0x28] sm:$0xff] }
  0xcc   :  { %201 = vst.msk [vmem:[#allocation2 + $0x30] sm:$0xff] %vm64_vm0, %v192_v4  ;;  %v221_v6 = vmul.f32 %v559_v32, %v212_v5 }
  0xce   :  { %382 = vmatmul.msk.f32.gmra.mxu2 %vm64_vm0, %v221_v6  ;;  %391 = vmatmul.msk.f32.gmra.mxu3 %vm64_vm0, %v221_v6 }
  0xcf   :  { %v142_v7 = vpop.f32.mrf.mxu0  ;;  %v183_v9 = vpop.f32.mrf.mxu1 }
  0xd0   :  { %v184_v10 = vadd.f32 %v183_v9, %v142_v7 }
  0xd2   :  { %v193_v11 = vadd.f32 %v184_v10, %v80_v8 }
  0xd3   :  { %v213_v12 = vld [vmem:[#allocation2 + $0x30] sm:$0xff] }
  0xd4   :  { %202 = vst.msk [vmem:[#allocation2 + $0x38] sm:$0xff] %vm64_vm0, %v193_v11  ;;  %v222_v13 = vmul.f32 %v559_v32, %v213_v12 }
  0xd6   :  { %383 = vmatmul.msk.f32.gmra.mxu2 %vm64_vm0, %v222_v13  ;;  %392 = vmatmul.msk.f32.gmra.mxu3 %vm64_vm0, %v222_v13 }
  0xdb   :  { %v214_v14 = vld [vmem:[#allocation2 + $0x38] sm:$0xff] }
  0xdc   :  { %v223_v15 = vmul.f32 %v559_v32, %v214_v14 }
  0xde   :  { %384 = vmatmul.msk.f32.gmra.mxu2 %vm64_vm0, %v223_v15  ;;  %393 = vmatmul.msk.f32.gmra.mxu3 %vm64_vm0, %v223_v15 }
 0x129   :  { %v275_v16 = vpop.f32.mrf.mxu2  ;;  %v316_v17 = vpop.f32.mrf.mxu3 }
 0x12a   :  { %340 = vst [vmem:[#allocation11] sm:$0xff] %v275_v16 }
 0x12b   :  { %341 = vst [vmem:[#allocation11 + $0x8] sm:$0xff] %v316_v17 }
 0x131   :  { %v278_v18 = vpop.f32.mrf.mxu2  ;;  %v319_v19 = vpop.f32.mrf.mxu3 }
 0x132   :  { %342 = vst [vmem:[#allocation11 + $0x10] sm:$0xff] %v278_v18 }
 0x133   :  { %343 = vst [vmem:[#allocation11 + $0x18] sm:$0xff] %v319_v19 }
 0x139   :  { %v281_v20 = vpop.f32.mrf.mxu2  ;;  %v322_v21 = vpop.f32.mrf.mxu3 }
 0x13a   :  { %344 = vst [vmem:[#allocation11 + $0x20] sm:$0xff] %v281_v20 }
 0x13b   :  { %345 = vst [vmem:[#allocation11 + $0x28] sm:$0xff] %v322_v21 }
 0x141   :  { %v284_v22 = vpop.f32.mrf.mxu2  ;;  %v325_v23 = vpop.f32.mrf.mxu3 }
 0x142   :  { %346 = vst [vmem:[#allocation11 + $0x30] sm:$0xff] %v284_v22 }
 0x143   :  { %347 = vst [vmem:[#allocation11 + $0x38] sm:$0xff] %v325_v23 }
 0x149   :  { %v287_v24 = vpop.f32.mrf.mxu2  ;;  %v328_v25 = vpop.f32.mrf.mxu3 }
 0x14a   :  { %348 = vst [vmem:[#allocation11 + $0x40] sm:$0xff] %v287_v24 }
 0x14b   :  { %349 = vst [vmem:[#allocation11 + $0x48] sm:$0xff] %v328_v25 }
 0x151   :  { %v290_v26 = vpop.f32.mrf.mxu2  ;;  %v331_v27 = vpop.f32.mrf.mxu3 }
 0x152   :  { %350 = vst [vmem:[#allocation11 + $0x50] sm:$0xff] %v290_v26 }
 0x153   :  { %351 = vst [vmem:[#allocation11 + $0x58] sm:$0xff] %v331_v27 }
 0x159   :  { %v293_v28 = vpop.f32.mrf.mxu2  ;;  %v334_v29 = vpop.f32.mrf.mxu3 }
 0x15a   :  { %352 = vst [vmem:[#allocation11 + $0x60] sm:$0xff] %v293_v28 }
 0x15b   :  { %353 = vst [vmem:[#allocation11 + $0x68] sm:$0xff] %v334_v29 }
 0x161   :  { %v296_v30 = vpop.f32.mrf.mxu2  ;;  %v337_v31 = vpop.f32.mrf.mxu3 }
 0x162   :  { %354 = vst [vmem:[#allocation11 + $0x70] sm:$0xff] %v296_v30 }
 0x163   :  { %355 = vst [vmem:[#allocation11 + $0x78] sm:$0xff] %v337_v31 }
 0x164   :  { %368 = dma.vmem_to_hbm [thread:$0]  %s361_s5, 2048, %s363_s8, [#allocation7], %s505_s25, %s505_s25, %s506_s26  }
 0x165   :  { %501 = dma.done.wait [#allocation7], 2048  }
 0x166   :  { %502 = vsyncadd [#allocation7], 4294965248 }
 0x167   :  { %373 = vsyncpa [#allocation6], 1 }
 0x168   :  { %374 = vsyncpa [#allocation9], 1 }
 0x169   :  { %375 = vsyncpa [#allocation7], 1 }

</bundles_post_ra>
